<compile_context>
chip_gen: v7x
topology: tpu7x:2x2x1
jax: 0.10.0
libtpu: 0.0.40
codegen_flags: <defaults>
</compile_context>

<pallas_src>
import jax
import jax.numpy as jnp
from jax.experimental import pallas as pl
from jax.experimental.pallas import tpu as pltpu

IN_DIM = 39
H1_DIM = 50
H2_DIM = 128
OUT_DIM = 10

H1_PAD = 128          # hidden-1 padded 50 -> 128 (lane-dense h1 / K of fc2)
DEFAULT_BLOCK_B = 2048  # rows per grid step; small enough for v7x's 64 MiB VMEM


def _round_up(n, m):
    return ((n + m - 1) // m) * m


def dnn_kernel(x_ref, w1_ref, b1_ref, w2_ref, b2_ref, w3_ref, b3_ref, out_ref):
    x = x_ref[...]                                       # (BB, 39) bf16

    # fc1: Linear(39, 50 zero-padded to 128) + ReLU   (Dropout -> identity in eval)
    h1 = jnp.dot(x, w1_ref[...], preferred_element_type=jnp.float32) + b1_ref[...]
    h1 = jnp.maximum(h1, 0.0).astype(jnp.bfloat16)       # padded lanes stay exactly 0

    # fc2: Linear(50 -> 128 zero-padded rows, 128) + ReLU (Dropout -> identity in eval)
    h2 = jnp.dot(h1, w2_ref[...], preferred_element_type=jnp.float32) + b2_ref[...]
    h2 = jnp.maximum(h2, 0.0).astype(jnp.bfloat16)

    # out: Linear(128, 10)
    logits = jnp.dot(h2, w3_ref[...], preferred_element_type=jnp.float32) + b3_ref[...]

    # LogSoftmax(dim=1), numerically stable, computed on the f32 accumulator
    m = jnp.max(logits, axis=-1, keepdims=True)
    shifted = logits - m
    lse = jnp.log(jnp.sum(jnp.exp(shifted), axis=-1, keepdims=True))
    out_ref[...] = shifted - lse


def dnn_forward(x, params, block_b=DEFAULT_BLOCK_B):
    w1, b1, w2, b2, w3, b3 = params
    batch = x.shape[0]

    # Batch tiling: keep blocks sublane-aligned (16 for bf16) and pad the ragged tail.
    bb = min(block_b, _round_up(batch, 16))
    padded_batch = _round_up(batch, bb)
    if padded_batch != batch:
        x = jnp.pad(x, ((0, padded_batch - batch), (0, 0)))
    x = x.astype(jnp.bfloat16)

    grid = (padded_batch // bb,)

    x_spec = pl.BlockSpec((bb, IN_DIM), lambda i: (i, 0))
    out_spec = pl.BlockSpec((bb, OUT_DIM), lambda i: (i, 0))

    # Weights / biases: full-array blocks with a constant index_map -> VMEM-resident
    # across all grid steps (no re-DMA per block).
    def resident(a):
        return pl.BlockSpec(a.shape, lambda i: (0,) * a.ndim)

    weight_elems = IN_DIM * H1_PAD + H1_PAD * H2_DIM + H2_DIM * OUT_DIM
    flops = 2 * padded_batch * weight_elems
    bytes_accessed = (
        padded_batch * IN_DIM * 2        # x read (bf16)
        + padded_batch * OUT_DIM * 4     # out write (f32)
        + weight_elems * 2               # bf16 weights
        + (H1_PAD + H2_DIM + OUT_DIM) * 4  # f32 biases
    )

    out = pl.pallas_call(
        dnn_kernel,
        out_shape=jax.ShapeDtypeStruct((padded_batch, OUT_DIM), jnp.float32),
        grid_spec=pltpu.PrefetchScalarGridSpec(
            num_scalar_prefetch=0,
            grid=grid,
            in_specs=[x_spec, resident(w1), resident(b1), resident(w2),
                      resident(b2), resident(w3), resident(b3)],
            out_specs=out_spec,
        ),
        compiler_params=pltpu.CompilerParams(
            dimension_semantics=("parallel",),
        ),
        cost_estimate=pl.CostEstimate(
            flops=flops,
            transcendentals=padded_batch * (OUT_DIM + 1),
            bytes_accessed=bytes_accessed,
        ),
    )(x, w1, b1, w2, b2, w3, b3)

    return out[:batch]


def init_params(key):
    """PyTorch nn.Linear-style init (uniform +/- 1/sqrt(fan_in)), weights pre-transposed
    to (in, out), hidden-1 zero-padded 50 -> 128, weights cast to bf16, biases kept f32."""
    ks = jax.random.split(key, 6)

    def linear(kw, kb, fan_in, fan_out):
        bound = 1.0 / jnp.sqrt(float(fan_in))
        w = jax.random.uniform(kw, (fan_in, fan_out), jnp.float32, -bound, bound)
        b = jax.random.uniform(kb, (1, fan_out), jnp.float32, -bound, bound)
        return w, b

    w1, b1 = linear(ks[0], ks[1], IN_DIM, H1_DIM)      # (39, 50), (1, 50)
    w2, b2 = linear(ks[2], ks[3], H1_DIM, H2_DIM)      # (50, 128), (1, 128)
    w3, b3 = linear(ks[4], ks[5], H2_DIM, OUT_DIM)     # (128, 10), (1, 10)

    # Zero-pad hidden-1: padded output cols/bias of fc1 and input rows of fc2 are zero,
    # so padded activations are exactly 0 through Linear+ReLU and contribute nothing.
    w1p = jnp.zeros((IN_DIM, H1_PAD), jnp.float32).at[:, :H1_DIM].set(w1)
    b1p = jnp.zeros((1, H1_PAD), jnp.float32).at[:, :H1_DIM].set(b1)
    w2p = jnp.zeros((H1_PAD, H2_DIM), jnp.float32).at[:H1_DIM, :].set(w2)

    return (w1p.astype(jnp.bfloat16), b1p,
            w2p.astype(jnp.bfloat16), b2,
            w3.astype(jnp.bfloat16), b3)


def dnn_reference(x, params):
    """Pure-JAX reference mirroring the kernel's bf16/f32 mixed-precision path."""
    w1, b1, w2, b2, w3, b3 = params
    xb = x.astype(jnp.bfloat16)
    h1 = jnp.maximum(jnp.dot(xb, w1, preferred_element_type=jnp.float32) + b1, 0.0)
    h1 = h1.astype(jnp.bfloat16)
    h2 = jnp.maximum(jnp.dot(h1, w2, preferred_element_type=jnp.float32) + b2, 0.0)
    h2 = h2.astype(jnp.bfloat16)
    logits = jnp.dot(h2, w3, preferred_element_type=jnp.float32) + b3
    return jax.nn.log_softmax(logits, axis=-1)


if __name__ == "__main__":
    key = jax.random.PRNGKey(0)
    pkey, xkey = jax.random.split(key)
    params = init_params(pkey)

    batch = 8
    x = jax.random.normal(xkey, (batch, IN_DIM), dtype=jnp.float32)

    out = dnn_forward(x, params)
    out = jax.block_until_ready(out)

    assert out.shape == (batch, OUT_DIM)

    # sanity: log-softmax rows should exponentiate-and-sum to ~1
    row_sums = jnp.sum(jnp.exp(out), axis=-1)
    assert bool(jnp.all(jnp.abs(row_sums - 1.0) < 1e-3))

    # sanity: match the pure-JAX mixed-precision reference
    ref = dnn_reference(x, params)
    assert bool(jnp.all(jnp.abs(out - ref) < 2e-2))

    print("KERNEL_OK")
</pallas_src>

<mosaic_0001>
module attributes {stable_mosaic.version = 11 : i64} {
  func.func @dnn_kernel(%arg0: i32, %arg1: memref<16x39xbf16, #tpu.memory_space<vmem>>, %arg2: memref<39x128xbf16, #tpu.memory_space<vmem>>, %arg3: memref<1x128xf32, #tpu.memory_space<vmem>>, %arg4: memref<128x128xbf16, #tpu.memory_space<vmem>>, %arg5: memref<1x128xf32, #tpu.memory_space<vmem>>, %arg6: memref<128x10xbf16, #tpu.memory_space<vmem>>, %arg7: memref<1x10xf32, #tpu.memory_space<vmem>>, %arg8: memref<16x10xf32, #tpu.memory_space<vmem>>) attributes {dimension_semantics = [#tpu.dimension_semantics<parallel>], iteration_bounds = array<i64: 1>, scalar_prefetch = 0 : i64, scratch_operands = 0 : i64, tpu.core_type = #tpu.core_type<tc>, window_params = [{transform_indices = @transform_0, window_bounds = array<i64: 16, 39>}, {pipeline_mode = #tpu.pipeline_mode<synchronous>, transform_indices = @transform_1, window_bounds = array<i64: 39, 128>}, {pipeline_mode = #tpu.pipeline_mode<synchronous>, transform_indices = @transform_2, window_bounds = array<i64: 1, 128>}, {pipeline_mode = #tpu.pipeline_mode<synchronous>, transform_indices = @transform_3, window_bounds = array<i64: 128, 128>}, {pipeline_mode = #tpu.pipeline_mode<synchronous>, transform_indices = @transform_4, window_bounds = array<i64: 1, 128>}, {pipeline_mode = #tpu.pipeline_mode<synchronous>, transform_indices = @transform_5, window_bounds = array<i64: 128, 10>}, {pipeline_mode = #tpu.pipeline_mode<synchronous>, transform_indices = @transform_6, window_bounds = array<i64: 1, 10>}, {transform_indices = @transform_7, window_bounds = array<i64: 16, 10>}]} {
    %c0 = arith.constant 0 : index
    %c0_0 = arith.constant 0 : index
    %0 = vector.load %arg1[%c0, %c0_0] : memref<16x39xbf16, #tpu.memory_space<vmem>>, vector<16x39xbf16>
    %c0_1 = arith.constant 0 : index
    %c0_2 = arith.constant 0 : index
    %1 = vector.load %arg2[%c0_1, %c0_2] : memref<39x128xbf16, #tpu.memory_space<vmem>>, vector<39x128xbf16>
    %cst = arith.constant dense<0.000000e+00> : vector<16x128xf32>
    %2 = tpu.matmul %0, %1, %cst {dimension_numbers = #tpu.dot_dimension_numbers<[1], [0], [0], [1], [0, 0, 1, 1], [], []>} : vector<16x39xbf16>, vector<39x128xbf16>, vector<16x128xf32> -> vector<16x128xf32>
    %c0_3 = arith.constant 0 : index
    %c0_4 = arith.constant 0 : index
    %3 = vector.load %arg3[%c0_3, %c0_4] : memref<1x128xf32, #tpu.memory_space<vmem>>, vector<1x128xf32>
    %4 = vector.broadcast %3 : vector<1x128xf32> to vector<16x128xf32>
    %5 = arith.addf %2, %4 : vector<16x128xf32>
    %cst_5 = arith.constant 0.000000e+00 : f32
    %6 = vector.broadcast %cst_5 : f32 to vector<16x128xf32>
    %7 = arith.maximumf %5, %6 : vector<16x128xf32>
    %8 = arith.truncf %7 : vector<16x128xf32> to vector<16x128xbf16>
    %c0_6 = arith.constant 0 : index
    %c0_7 = arith.constant 0 : index
    %9 = vector.load %arg4[%c0_6, %c0_7] : memref<128x128xbf16, #tpu.memory_space<vmem>>, vector<128x128xbf16>
    %cst_8 = arith.constant dense<0.000000e+00> : vector<16x128xf32>
    %10 = tpu.matmul %8, %9, %cst_8 {dimension_numbers = #tpu.dot_dimension_numbers<[1], [0], [0], [1], [0, 0, 1, 1], [], []>} : vector<16x128xbf16>, vector<128x128xbf16>, vector<16x128xf32> -> vector<16x128xf32>
    %c0_9 = arith.constant 0 : index
    %c0_10 = arith.constant 0 : index
    %11 = vector.load %arg5[%c0_9, %c0_10] : memref<1x128xf32, #tpu.memory_space<vmem>>, vector<1x128xf32>
    %12 = vector.broadcast %11 : vector<1x128xf32> to vector<16x128xf32>
    %13 = arith.addf %10, %12 : vector<16x128xf32>
    %cst_11 = arith.constant 0.000000e+00 : f32
    %14 = vector.broadcast %cst_11 : f32 to vector<16x128xf32>
    %15 = arith.maximumf %13, %14 : vector<16x128xf32>
    %16 = arith.truncf %15 : vector<16x128xf32> to vector<16x128xbf16>
    %c0_12 = arith.constant 0 : index
    %c0_13 = arith.constant 0 : index
    %17 = vector.load %arg6[%c0_12, %c0_13] : memref<128x10xbf16, #tpu.memory_space<vmem>>, vector<128x10xbf16>
    %cst_14 = arith.constant dense<0.000000e+00> : vector<16x10xf32>
    %18 = tpu.matmul %16, %17, %cst_14 {dimension_numbers = #tpu.dot_dimension_numbers<[1], [0], [0], [1], [0, 0, 1, 1], [], []>} : vector<16x128xbf16>, vector<128x10xbf16>, vector<16x10xf32> -> vector<16x10xf32>
    %c0_15 = arith.constant 0 : index
    %c0_16 = arith.constant 0 : index
    %19 = vector.load %arg7[%c0_15, %c0_16] : memref<1x10xf32, #tpu.memory_space<vmem>>, vector<1x10xf32>
    %20 = vector.broadcast %19 : vector<1x10xf32> to vector<16x10xf32>
    %21 = arith.addf %18, %20 : vector<16x10xf32>
    %cst_17 = arith.constant dense<0xFF800000> : vector<16xf32>
    %22 = vector.multi_reduction <maximumf>, %21, %cst_17 [1] : vector<16x10xf32> to vector<16xf32>
    %23 = vector.shape_cast %22 : vector<16xf32> to vector<16x1xf32>
    %24 = vector.broadcast %23 : vector<16x1xf32> to vector<16x10xf32>
    %25 = arith.subf %21, %24 : vector<16x10xf32>
    %26 = math.exp %25 : vector<16x10xf32>
    %cst_18 = arith.constant dense<0.000000e+00> : vector<16xf32>
    %27 = vector.multi_reduction <add>, %26, %cst_18 [1] : vector<16x10xf32> to vector<16xf32>
    %28 = vector.shape_cast %27 : vector<16xf32> to vector<16x1xf32>
    %29 = math.log %28 : vector<16x1xf32>
    %30 = vector.broadcast %29 : vector<16x1xf32> to vector<16x10xf32>
    %31 = arith.subf %25, %30 : vector<16x10xf32>
    %c0_19 = arith.constant 0 : index
    %c0_20 = arith.constant 0 : index
    %32 = vector.load %arg8[%c0_19, %c0_20] : memref<16x10xf32, #tpu.memory_space<vmem>>, vector<16x10xf32>
    tpu.vector_store %arg8[%c0_19, %c0_20], %31 {strides = array<i32>} : memref<16x10xf32, #tpu.memory_space<vmem>>, vector<16x10xf32>,
    return
  }
  func.func @transform_0(%arg0: i32) -> (i32, i32) {
    %c0_i32 = arith.constant 0 : i32
    %c0_i32_0 = arith.constant 0 : i32
    return %arg0, %c0_i32 : i32, i32
  }
  func.func @transform_1(%arg0: i32) -> (i32, i32) {
    %c0_i32 = arith.constant 0 : i32
    %c0_i32_0 = arith.constant 0 : i32
    %c0_i32_1 = arith.constant 0 : i32
    return %c0_i32, %c0_i32_0 : i32, i32
  }
  func.func @transform_2(%arg0: i32) -> (i32, i32) {
    %c0_i32 = arith.constant 0 : i32
    %c0_i32_0 = arith.constant 0 : i32
    %c0_i32_1 = arith.constant 0 : i32
    return %c0_i32, %c0_i32_0 : i32, i32
  }
  func.func @transform_3(%arg0: i32) -> (i32, i32) {
    %c0_i32 = arith.constant 0 : i32
    %c0_i32_0 = arith.constant 0 : i32
    %c0_i32_1 = arith.constant 0 : i32
    return %c0_i32, %c0_i32_0 : i32, i32
  }
  func.func @transform_4(%arg0: i32) -> (i32, i32) {
    %c0_i32 = arith.constant 0 : i32
    %c0_i32_0 = arith.constant 0 : i32
    %c0_i32_1 = arith.constant 0 : i32
    return %c0_i32, %c0_i32_0 : i32, i32
  }
  func.func @transform_5(%arg0: i32) -> (i32, i32) {
    %c0_i32 = arith.constant 0 : i32
    %c0_i32_0 = arith.constant 0 : i32
    %c0_i32_1 = arith.constant 0 : i32
    return %c0_i32, %c0_i32_0 : i32, i32
  }
  func.func @transform_6(%arg0: i32) -> (i32, i32) {
    %c0_i32 = arith.constant 0 : i32
    %c0_i32_0 = arith.constant 0 : i32
    %c0_i32_1 = arith.constant 0 : i32
    return %c0_i32, %c0_i32_0 : i32, i32
  }
  func.func @transform_7(%arg0: i32) -> (i32, i32) {
    %c0_i32 = arith.constant 0 : i32
    %c0_i32_0 = arith.constant 0 : i32
    return %arg0, %c0_i32 : i32, i32
  }
}

</mosaic_0001>

<bundles_post_ra>
// kernel: tpu_custom_call.1
= control target key start
LH: loop header
LB: loop body
LE: loop exit
PB: predicated region body
PF: predicated region fallthrough
CT: control target
= control target key end

     0   :  { %12 = vsyncpa [#allocation3], 0  ;;  %s747_s0 = inlined_call_operand.vmem [shape: bf16[16,39], index: 0, kind: input, shape index: {}]   ;;  %s748_s1 = inlined_call_operand.hbm [shape: bf16[39,128], index: 1, kind: input, shape index: {}]   ;;  %s749_s2 = inlined_call_operand.vmem [shape: f32[1,128], index: 2, kind: input, shape index: {}]   ;;  %s750_s3 = inlined_call_operand.vmem [shape: bf16[128,128], index: 3, kind: input, shape index: {}]   ;;  %s751_s4 = inlined_call_operand.vmem [shape: f32[1,128], index: 4, kind: input, shape index: {}]   ;;  %s752_s5 = inlined_call_operand.vmem [shape: bf16[128,10], index: 5, kind: input, shape index: {}]   ;;  %s753_s6 = inlined_call_operand.vmem [shape: f32[1,10], index: 6, kind: input, shape index: {}]   ;;  %s754_s7 = inlined_call_operand.hbm [shape: f32[16,10], index: 7, kind: output, shape index: {}]  }
   0x1   :  { %13 = vsyncpa [#allocation4], 0  ;;  %s583_s24 = smov [#allocation2]   ;;  %s535_s28 = scalar_lea.hbm %s748_s1, 320 }
   0x2   :  { %s21_s25 = sshll.u32 %s583_s24, 4  ;;  %p536_p0 = scmp.ne.s32.totalorder %s748_s1, %s535_s28  ;;  %s22_s25 = int_to_ptr.vmem [resolvable:$true] %s21_s25 }
   0x3   :  { %p539_p1 = scmp.lt.u32.totalorder %s535_s28, %s748_s1 }
   0x5   :  { %p541_p2 = pnand %p539_p1, %p536_p0 }
   0x7   :  { %544 = shalt.err (!%p541_p2)
}
   0x8   :  { %s545_s10 = scalar_lea.vmem %s22_s25, 320  ;;  %p550_p4 = scmp.lt.s32.totalorder %s22_s25, %s22_s25 }
   0x9   :  { %p546_p3 = scmp.ne.s32.totalorder %s22_s25, %s545_s10  ;;  %p551_p5 = scmp.lt.s32.totalorder %s545_s10, %s545_s10 }
   0xb   :  { %p552_p6 = por %p551_p5, %p550_p4 }
   0xd   :  { %p553_p7 = pnand %p552_p6, %p546_p3 }
   0xf   :  { %556 = shalt.err (!%p553_p7)
}
  0x10   :  { %s584_s11 = smov 64   ;;  %s585_s12 = smov 4  }
  0x11   :  { %27 = dma.hbm_to_vmem [thread:$0]  %s748_s1, 320, %s22_s25, [#allocation3], %s584_s11, %s584_s11, %s585_s12  }
  0x12   :  { %579 = dma.done.wait [#allocation3], 320  }
  0x13   :  { %580 = vsyncadd [#allocation3], 4294966976  ;;  %v586_v0 = vmov 0.0   ;;  %vm587_vm0 = vmmov 0   ;;  %vm80_vm1 = vcmask 1042432   ;;  %vm81_vm2 = vcmask 1043456  }
  0x14   :  { %448 = vmatprep.subr.bf16.mxu0 %v586_v0  ;;  %458 = vmatprep.subr.bf16.mxu1 %v586_v0  ;;  %v507_v1 = vld [vmem:[#allocation2] sm:$0xff]   ;;  %v588_v2 = vmov 65535   ;;  %v508_v4 = vld [vmem:[#allocation2 + $0x8] sm:$0xff]   ;;  %v509_v5 = vld [vmem:[#allocation2 + $0x10] ss:$0 sps:$4 sm:$0xff]   ;;  %vm76_vm3 = vcmask 318464  }
  0x15   :  { %454 = vmatprep.mubr.msk.bf16.mxu0 %vm587_vm0, %v586_v0  ;;  %474 = vmatprep.mubr.msk.bf16.mxu1 %vm587_vm0, %v586_v0  ;;  %v82_v3 = vsel %vm80_vm1, 4294967295, %v588_v2  ;;  %v511_v7 = vld [vmem:[%s750_s3] sm:$0xff]   ;;  %v512_v9 = vld [vmem:[%s750_s3 + $0x8] sm:$0xff]   ;;  %v513_v11 = vld [vmem:[%s750_s3 + $0x10] sm:$0xff]   ;;  %vm358_vm4 = vcmask 80896  }
  0x16   :  { %449 = vmatpush3.bf16.msra.mxu0 %v507_v1  ;;  %v83_v6 = vsel %vm81_vm2, %v82_v3, 0  ;;  %459 = vmatpush3.bf16.msra.mxu1 %v511_v7  ;;  %v510_v10 = vld [vmem:[%s747_s0] sm:$0xff]   ;;  %v514_v12 = vld [vmem:[%s750_s3 + $0x18] sm:$0xff]   ;;  %v516_v14 = vld [vmem:[%s750_s3 + $0x28] sm:$0xff]  }
  0x17   :  { %450 = vmatprep.subr.bf16.mxu0 %v586_v0  ;;  %v85_v8 = vand.u32 %v509_v5, %v83_v6  ;;  %460 = vmatprep.subr.bf16.mxu1 %v586_v0  ;;  %v515_v13 = vld [vmem:[%s750_s3 + $0x20] sm:$0xff]   ;;  %v517_v15 = vld [vmem:[%s750_s3 + $0x30] sm:$0xff]   ;;  %v518_v16 = vld [vmem:[%s750_s3 + $0x38] sm:$0xff]  }
  0x18   :  { %v519_v17 = vld [vmem:[%s752_s5] sm:$0xff]   ;;  %v520_v18 = vld [vmem:[%s752_s5 + $0x8] sm:$0xff]   ;;  %v521_v19 = vld [vmem:[%s752_s5 + $0x10] sm:$0xff]  }
  0x19   :  { %v522_v20 = vld [vmem:[%s752_s5 + $0x18] sm:$0xff]   ;;  %v523_v21 = vld [vmem:[%s752_s5 + $0x20] sm:$0xff]   ;;  %v524_v22 = vld [vmem:[%s752_s5 + $0x28] sm:$0xff]  }
  0x1a   :  { %451 = vmatpush3.bf16.msra.mxu0 %v508_v4  ;;  %461 = vmatpush3.bf16.msra.mxu1 %v512_v9  ;;  %v402_v23 = vld [vmem:[%s749_s2] ss:$0 sm:$0xff]  ;;  %v525_v33 = vld [vmem:[%s752_s5 + $0x30] sm:$0xff]   ;;  %v526_v34 = vld [vmem:[%s752_s5 + $0x38] sm:$0xff]  }
  0x1b   :  { %452 = vmatprep.subr.bf16.mxu0 %v586_v0  ;;  %462 = vmatprep.subr.bf16.mxu1 %v586_v0  ;;  %v408_v35 = vld [vmem:[%s751_s4] ss:$0 sm:$0xff]  ;;  %s589_s4 = smov [#allocation5]  }
  0x1c   :  { %v417_v45 = vld [vmem:[%s753_s6] ss:$0 sm:$0xff]  ;;  %s390_s5 = sshll.u32 %s589_s4, 4  ;;  %s391_s5 = int_to_ptr.vmem [resolvable:$true] %s390_s5 }
  0x1d   :  { %s557_s6 = scalar_lea.vmem %s391_s5, 256  ;;  %p562_p9 = scmp.lt.s32.totalorder %s391_s5, %s391_s5 }
  0x1e   :  { %453 = vmatpush3.bf16.msra.mxu0 %v85_v8  ;;  %463 = vmatpush3.bf16.msra.mxu1 %v513_v11  ;;  %p558_p8 = scmp.ne.s32.totalorder %s391_s5, %s557_s6  ;;  %p563_p10 = scmp.lt.s32.totalorder %s557_s6, %s557_s6 }
  0x1f   :  { %478 = vmatprep.subr.bf16.mxu0 %v586_v0  ;;  %464 = vmatprep.subr.bf16.mxu1 %v586_v0 }
  0x20   :  { %p564_p11 = por %p563_p10, %p562_p9 }
  0x21   :  { %455 = vmatmul.mubr.msk.bf16.vlgmr.msra.gmra.mrb[0].mxu0 %vm76_vm3, %v510_v10 }
  0x22   :  { %494 = vmatprep.mubr.msk.bf16.mxu0 %vm587_vm0, %v586_v0  ;;  %465 = vmatpush3.bf16.msra.mxu1 %v514_v12  ;;  %p565_p12 = pnand %p564_p11, %p558_p8 }
  0x23   :  { %466 = vmatprep.subr.bf16.mxu1 %v586_v0  ;;  %479 = vmatpush3.bf16.msra.mxu0 %v519_v17 }
  0x24   :  { %480 = vmatprep.subr.bf16.mxu0 %v586_v0 }
  0x26   :  { %467 = vmatpush3.bf16.msra.mxu1 %v515_v13 }
  0x27   :  { %468 = vmatprep.subr.bf16.mxu1 %v586_v0  ;;  %481 = vmatpush3.bf16.msra.mxu0 %v520_v18 }
  0x28   :  { %482 = vmatprep.subr.bf16.mxu0 %v586_v0 }
  0x2a   :  { %469 = vmatpush3.bf16.msra.mxu1 %v516_v14 }
  0x2b   :  { %470 = vmatprep.subr.bf16.mxu1 %v586_v0  ;;  %483 = vmatpush3.bf16.msra.mxu0 %v521_v19 }
  0x2c   :  { %484 = vmatprep.subr.bf16.mxu0 %v586_v0 }
  0x2e   :  { %471 = vmatpush3.bf16.msra.mxu1 %v517_v15 }
  0x2f   :  { %472 = vmatprep.subr.bf16.mxu1 %v586_v0  ;;  %485 = vmatpush3.bf16.msra.mxu0 %v522_v20 }
  0x30   :  { %486 = vmatprep.subr.bf16.mxu0 %v586_v0 }
  0x32   :  { %473 = vmatpush3.bf16.msra.mxu1 %v518_v16 }
  0x33   :  { %487 = vmatpush3.bf16.msra.mxu0 %v523_v21 }
  0x34   :  { %488 = vmatprep.subr.bf16.mxu0 %v586_v0 }
  0x37   :  { %489 = vmatpush3.bf16.msra.mxu0 %v524_v22 }
  0x38   :  { %490 = vmatprep.subr.bf16.mxu0 %v586_v0 }
  0x3b   :  { %491 = vmatpush3.bf16.msra.mxu0 %v525_v33 }
  0x3c   :  { %492 = vmatprep.subr.bf16.mxu0 %v586_v0 }
  0x3f   :  { %493 = vmatpush3.bf16.msra.mxu0 %v526_v34 }
  0xf4   :  { %v121_v24 = vpop.f32.mrb[0].mxu0 }
  0xf5   :  { %v122_v25 = vadd.f32 %v402_v23, %v121_v24  ;;  %v456_v26 = vpop.f32.mrb[1].mxu0 }
  0xf6   :  { %v124_v27 = vpop.f32.mrb[2].mxu0 }
  0xf7   :  { %v125_v28 = vadd.f32 %v402_v23, %v124_v27  ;;  %v457_v29 = vpop.f32.mrb[3].mxu0  ;;  %v128_v30 = vmax.f32 %v122_v25, 0.0 }
  0xf9   :  { %v129_v31 = vmax.f32 %v125_v28, 0.0 }
  0xfb   :  { %v130_v32 = vpack.c.bf16 %v129_v31, %v128_v30 }
  0xfd   :  { %475 = vmatmul.mubr.bf16.vlgmr.msra.gmra.mrb[0].mxu1 %v130_v32 }
 0x1d0   :  { %v236_v36 = vpop.f32.mrb[0].mxu1 }
 0x1d1   :  { %v237_v37 = vadd.f32 %v408_v35, %v236_v36  ;;  %v476_v38 = vpop.f32.mrb[1].mxu1 }
 0x1d2   :  { %v239_v39 = vpop.f32.mrb[2].mxu1 }
 0x1d3   :  { %v240_v40 = vadd.f32 %v408_v35, %v239_v39  ;;  %v477_v41 = vpop.f32.mrb[3].mxu1  ;;  %v243_v42 = vmax.f32 %v237_v37, 0.0 }
 0x1d5   :  { %v244_v43 = vmax.f32 %v240_v40, 0.0 }
 0x1d7   :  { %v245_v44 = vpack.c.bf16 %v244_v43, %v243_v42 }
 0x1d9   :  { %495 = vmatmul.mubr.bf16.vlgmr.msra.gmra.mrb[4].mxu0 %v245_v44 }
 0x2ac   :  { %v351_v46 = vpop.f32.mrb[4].mxu0 }
 0x2ad   :  { %v352_v47 = vadd.f32 %v417_v45, %v351_v46  ;;  %v496_v48 = vpop.f32.mrb[5].mxu0 }
 0x2ae   :  { %v354_v49 = vpop.f32.mrb[6].mxu0 }
 0x2af   :  { %v355_v50 = vadd.f32 %v417_v45, %v354_v49  ;;  %v497_v51 = vpop.f32.mrb[7].mxu0  ;;  %v359_v52 = vsel %vm358_vm4, %v352_v47, -inf }
 0x2b0   :  { %360 = vmax.xlane.f32.xlu0 %v359_v52 }
 0x2b1   :  { %v362_v53 = vsel %vm358_vm4, %v355_v50, -inf }
 0x2b4   :  { %363 = vmax.xlane.f32.xlu0 %v362_v53 }
 0x33d   :  { %v361_v54 = vpop.xlane.xlu0 %360 }
 0x33e   :  { %v365_v55 = vsub.f32 %v352_v47, %v361_v54 }
 0x340   :  { %v367_v56 = vmul.f32 1.442695, %v365_v55 }
 0x341   :  { %v364_v57 = vpop.xlane.xlu0 %363 }
 0x342   :  { %527 = vpow2.f32 %v367_v56  ;;  %v366_v58 = vsub.f32 %v355_v50, %v364_v57 }
 0x344   :  { %v369_v59 = vmul.f32 1.442695, %v366_v58 }
 0x346   :  { %529 = vpow2.f32 %v369_v59 }
 0x34c   :  { %v528_v60 = vpop.eup %527 }
 0x34d   :  { %v371_v61 = vsel %vm358_vm4, %v528_v60, 0.0 }
 0x34e   :  { %372 = vadd.xlane.f32.xlu1 %v371_v61 }
 0x350   :  { %v530_v62 = vpop.eup %529 }
 0x351   :  { %v374_v63 = vsel %vm358_vm4, %v530_v62, 0.0 }
 0x352   :  { %375 = vadd.xlane.f32.xlu1 %v374_v63 }
 0x3db   :  { %v373_v0 = vpop.xlane.xlu1 %372 }
 0x3dc   :  { %531 = vlog2.f32 %v373_v0 }
 0x3df   :  { %v376_v1 = vpop.xlane.xlu1 %375 }
 0x3e0   :  { %533 = vlog2.f32 %v376_v1 }
 0x3e6   :  { %v532_v2 = vpop.eup %531 }
 0x3e7   :  { %v378_v3 = vmul.f32 0.6931472, %v532_v2 }
 0x3e9   :  { %v381_v4 = vsub.f32 %v365_v55, %v378_v3 }
 0x3ea   :  { %v534_v5 = vpop.eup %533 }
 0x3eb   :  { %383 = vst.msk [vmem:[#allocation5] sm:$0xff] %vm358_vm4, %v381_v4  ;;  %v380_v6 = vmul.f32 0.6931472, %v534_v5 }
 0x3ed   :  { %v382_v7 = vsub.f32 %v366_v58, %v380_v6 }
 0x3ef   :  { %384 = vst.msk [vmem:[#allocation5 + $0x8] sm:$0xff] %vm358_vm4, %v382_v7 }
 0x3f0   :  { %568 = shalt.err (!%p565_p12)
}
 0x3f1   :  { %s569_s28 = scalar_lea.hbm %s754_s7, 256 }
 0x3f2   :  { %p570_p13 = scmp.ne.s32.totalorder %s754_s7, %s569_s28  ;;  %p573_p0 = scmp.lt.u32.totalorder %s569_s28, %s754_s7 }
 0x3f4   :  { %p575_p1 = pnand %p573_p0, %p570_p13 }
 0x3f6   :  { %578 = shalt.err (!%p575_p1)
}
 0x3f7   :  { %s590_s10 = smov 128   ;;  %s591_s11 = smov 8  }
 0x3f8   :  { %396 = dma.vmem_to_hbm [thread:$0]  %s391_s5, 256, %s754_s7, [#allocation4], %s590_s10, %s590_s10, %s591_s11  }
 0x3f9   :  { %581 = dma.done.wait [#allocation4], 256  }
 0x3fa   :  { %582 = vsyncadd [#allocation4], 4294967040 }
 0x3fb   :  { %400 = vsyncpa [#allocation3], 1 }
 0x3fc   :  { %401 = vsyncpa [#allocation4], 1 }

</bundles_post_ra>
